<compile_context>
chip_gen: v6e
topology: v6e:2x2x1
jax: 0.10.0
libtpu: 0.0.40
codegen_flags: <defaults>
</compile_context>

<pallas_src>
import functools

import jax
import jax.numpy as jnp
from jax.experimental import pallas as pl
from jax.experimental.pallas import tpu as pltpu


def _round_up(x, m):
    return (x + m - 1) // m * m


def _fused_actor_critic_kernel(
    x_ref,    # (TB, num_inputs)            compute dtype
    w1_ref,   # (num_inputs, 2*hidden)      compute dtype  [actor | critic]
    b1_ref,   # (1, 2*hidden)               float32
    w2_ref,   # (2*hidden, OUT_LANES)       compute dtype  block-diag, zero-padded
    b2_ref,   # (1, OUT_LANES)              float32
    out_ref,  # (TB, OUT_LANES)             float32: [probs | value | zeros]
    *,
    num_actions,
):
    tb, out_lanes = out_ref.shape

    # ----- layer 1, both heads fused: h = relu(x @ W1 + b1), f32 accumulate -----
    h = jnp.dot(x_ref[...], w1_ref[...], preferred_element_type=jnp.float32)
    h = jnp.maximum(h + b1_ref[...], 0.0)

    # ----- layer 2, both heads fused via block-diagonal lane-padded W2 -----
    y = jnp.dot(h.astype(w2_ref.dtype), w2_ref[...],
                preferred_element_type=jnp.float32)
    y = y + b2_ref[...]
    # y lanes: [0:num_actions] = actor logits, [num_actions] = value, rest = 0.

    lane = jax.lax.broadcasted_iota(jnp.int32, (tb, out_lanes), 1)
    is_logit = lane < num_actions

    # Numerically stable softmax over the actor lanes only; padded lanes -> exactly 0.
    masked = jnp.where(is_logit, y, -jnp.inf)
    m = jnp.max(masked, axis=-1, keepdims=True)
    e = jnp.exp(masked - m)
    denom = jnp.sum(e, axis=-1, keepdims=True)
    probs = e * pl.reciprocal(denom, approx=True)

    # Pack the critic value (lane == num_actions) into the same lane-dense slab.
    out = probs + jnp.where(lane == num_actions, y, 0.0)
    out_ref[...] = out.astype(out_ref.dtype)


@functools.partial(jax.jit, static_argnames=("compute_dtype",))
def actor_critic_forward(x, params, compute_dtype=jnp.bfloat16):
    """Returns (probs, value) — probs parameterize the Categorical distribution."""
    B, num_inputs = x.shape
    w1a, b1a, w2a, b2a, w1c, b1c, w2c, b2c = params
    hidden = w1a.shape[1]
    num_actions = w2a.shape[1]

    out_lanes = max(128, _round_up(num_actions + 1, 128))

    # ---- fuse actor + critic weights (layer 1 concat, layer 2 block-diagonal) ----
    w1 = jnp.concatenate([w1a, w1c], axis=1).astype(compute_dtype)    # (in, 2H)
    b1 = jnp.concatenate([b1a, b1c], axis=1).astype(jnp.float32)      # (1, 2H)

    w2 = jnp.zeros((2 * hidden, out_lanes), jnp.float32)
    w2 = w2.at[:hidden, :num_actions].set(w2a)        # actor head
    w2 = w2.at[hidden:, num_actions].set(w2c[:, 0])   # critic head
    w2 = w2.astype(compute_dtype)

    b2 = jnp.zeros((1, out_lanes), jnp.float32)
    b2 = b2.at[:, :num_actions].set(b2a)
    b2 = b2.at[:, num_actions].set(b2c[0, 0])

    # ---- batch tiling: parallel grid axis, weights stay VMEM-resident ----
    tb = 512 if B >= 512 else _round_up(B, 8)
    b_pad = _round_up(B, tb)
    x_p = x.astype(compute_dtype)
    if b_pad != B:
        x_p = jnp.pad(x_p, ((0, b_pad - B), (0, 0)))

    grid = (b_pad // tb,)
    kernel = functools.partial(_fused_actor_critic_kernel, num_actions=num_actions)

    out = pl.pallas_call(
        kernel,
        out_shape=jax.ShapeDtypeStruct((b_pad, out_lanes), jnp.float32),
        grid_spec=pltpu.PrefetchScalarGridSpec(
            num_scalar_prefetch=0,
            grid=grid,
            in_specs=[
                pl.BlockSpec((tb, num_inputs), lambda i: (i, 0)),
                pl.BlockSpec((num_inputs, 2 * hidden), lambda i: (0, 0)),
                pl.BlockSpec((1, 2 * hidden), lambda i: (0, 0)),
                pl.BlockSpec((2 * hidden, out_lanes), lambda i: (0, 0)),
                pl.BlockSpec((1, out_lanes), lambda i: (0, 0)),
            ],
            out_specs=pl.BlockSpec((tb, out_lanes), lambda i: (i, 0)),
        ),
        compiler_params=pltpu.CompilerParams(
            dimension_semantics=("parallel",),
        ),
    )(x_p, w1, b1, w2, b2)

    probs = out[:B, :num_actions]
    value = out[:B, num_actions:num_actions + 1]
    return probs, value


def init_params(key, num_inputs, num_actions, hidden=128):
    """Mimics torch.nn.Linear default init U(-1/sqrt(fan_in), +1/sqrt(fan_in)).

    Weights are stored transposed relative to PyTorch: (in_features, out_features).
    Biases are stored as (1, out_features) rows for TPU-friendly layout.
    """
    keys = jax.random.split(key, 8)

    def linear(kw, kb, fan_in, fan_out):
        bound = 1.0 / jnp.sqrt(float(fan_in))
        w = jax.random.uniform(kw, (fan_in, fan_out), jnp.float32, -bound, bound)
        b = jax.random.uniform(kb, (1, fan_out), jnp.float32, -bound, bound)
        return w, b

    w1a, b1a = linear(keys[0], keys[1], num_inputs, hidden)
    w2a, b2a = linear(keys[2], keys[3], hidden, num_actions)
    w1c, b1c = linear(keys[4], keys[5], num_inputs, hidden)
    w2c, b2c = linear(keys[6], keys[7], hidden, 1)
    return (w1a, b1a, w2a, b2a, w1c, b1c, w2c, b2c)


def reference_forward(x, params):
    """Pure-JAX reference of the PyTorch forward for verification."""
    w1a, b1a, w2a, b2a, w1c, b1c, w2c, b2c = params
    h_c = jnp.maximum(x @ w1c + b1c, 0.0)
    value = h_c @ w2c + b2c
    h_a = jnp.maximum(x @ w1a + b1a, 0.0)
    logits = h_a @ w2a + b2a
    probs = jax.nn.softmax(logits, axis=-1)
    return probs, value


if __name__ == "__main__":
    # Small shapes consistent with the module: batch=8, num_inputs=32, num_actions=4.
    B, num_inputs, num_actions = 8, 32, 4

    key = jax.random.PRNGKey(0)
    k_x, k_p = jax.random.split(key)
    x = jax.random.normal(k_x, (B, num_inputs), dtype=jnp.float32)
    params = init_params(k_p, num_inputs, num_actions)

    probs_ref, value_ref = reference_forward(x, params)

    # f32 compute path: tight correctness check.
    probs32, value32 = actor_critic_forward(x, params, compute_dtype=jnp.float32)
    jax.block_until_ready((probs32, value32))
    assert probs32.shape == (B, num_actions)
    assert value32.shape == (B, 1)
    assert jnp.allclose(probs32, probs_ref, atol=5e-3, rtol=5e-3)
    assert jnp.allclose(value32, value_ref, atol=1e-4, rtol=1e-4)
    assert jnp.allclose(jnp.sum(probs32, axis=-1), 1.0, atol=5e-3)

    # bf16 matmul-input fast path (v6e/v7x MXU rate), f32 accumulation/softmax.
    probs16, value16 = actor_critic_forward(x, params, compute_dtype=jnp.bfloat16)
    jax.block_until_ready((probs16, value16))
    assert jnp.allclose(probs16, probs_ref, atol=3e-2, rtol=3e-2)
    assert jnp.allclose(value16, value_ref, atol=3e-2, rtol=3e-2)

    # TODO(synk): torch.distributions.Categorical object construction has no
    # Pallas equivalent; the kernel returns its parameterizing `probs` instead.
    print("KERNEL_OK")
</pallas_src>

<mosaic_0001>
module attributes {stable_mosaic.version = 11 : i64} {
  func.func @_fused_actor_critic_kernel(%arg0: i32, %arg1: memref<8x32xf32, #tpu.memory_space<vmem>>, %arg2: memref<32x256xf32, #tpu.memory_space<vmem>>, %arg3: memref<1x256xf32, #tpu.memory_space<vmem>>, %arg4: memref<256x128xf32, #tpu.memory_space<vmem>>, %arg5: memref<1x128xf32, #tpu.memory_space<vmem>>, %arg6: memref<8x128xf32, #tpu.memory_space<vmem>>) attributes {dimension_semantics = [#tpu.dimension_semantics<parallel>], iteration_bounds = array<i64: 1>, scalar_prefetch = 0 : i64, scratch_operands = 0 : i64, tpu.core_type = #tpu.core_type<tc>, window_params = [{transform_indices = @transform_0, window_bounds = array<i64: 8, 32>}, {pipeline_mode = #tpu.pipeline_mode<synchronous>, transform_indices = @transform_1, window_bounds = array<i64: 32, 256>}, {pipeline_mode = #tpu.pipeline_mode<synchronous>, transform_indices = @transform_2, window_bounds = array<i64: 1, 256>}, {pipeline_mode = #tpu.pipeline_mode<synchronous>, transform_indices = @transform_3, window_bounds = array<i64: 256, 128>}, {pipeline_mode = #tpu.pipeline_mode<synchronous>, transform_indices = @transform_4, window_bounds = array<i64: 1, 128>}, {transform_indices = @transform_5, window_bounds = array<i64: 8, 128>}]} {
    %c0 = arith.constant 0 : index
    %c0_0 = arith.constant 0 : index
    %0 = vector.load %arg1[%c0, %c0_0] : memref<8x32xf32, #tpu.memory_space<vmem>>, vector<8x32xf32>
    %c0_1 = arith.constant 0 : index
    %c0_2 = arith.constant 0 : index
    %1 = vector.load %arg2[%c0_1, %c0_2] : memref<32x256xf32, #tpu.memory_space<vmem>>, vector<32x256xf32>
    %cst = arith.constant dense<0.000000e+00> : vector<8x256xf32>
    %2 = tpu.matmul %0, %1, %cst {dimension_numbers = #tpu.dot_dimension_numbers<[1], [0], [0], [1], [0, 0, 1, 1], [], []>} : vector<8x32xf32>, vector<32x256xf32>, vector<8x256xf32> -> vector<8x256xf32>
    %c0_3 = arith.constant 0 : index
    %c0_4 = arith.constant 0 : index
    %3 = vector.load %arg3[%c0_3, %c0_4] : memref<1x256xf32, #tpu.memory_space<vmem>>, vector<1x256xf32>
    %4 = vector.broadcast %3 : vector<1x256xf32> to vector<8x256xf32>
    %5 = arith.addf %2, %4 : vector<8x256xf32>
    %cst_5 = arith.constant 0.000000e+00 : f32
    %6 = vector.broadcast %cst_5 : f32 to vector<8x256xf32>
    %7 = arith.maximumf %5, %6 : vector<8x256xf32>
    %c0_6 = arith.constant 0 : index
    %c0_7 = arith.constant 0 : index
    %8 = vector.load %arg4[%c0_6, %c0_7] : memref<256x128xf32, #tpu.memory_space<vmem>>, vector<256x128xf32>
    %cst_8 = arith.constant dense<0.000000e+00> : vector<8x128xf32>
    %9 = tpu.matmul %7, %8, %cst_8 {dimension_numbers = #tpu.dot_dimension_numbers<[1], [0], [0], [1], [0, 0, 1, 1], [], []>} : vector<8x256xf32>, vector<256x128xf32>, vector<8x128xf32> -> vector<8x128xf32>
    %c0_9 = arith.constant 0 : index
    %c0_10 = arith.constant 0 : index
    %10 = vector.load %arg5[%c0_9, %c0_10] : memref<1x128xf32, #tpu.memory_space<vmem>>, vector<1x128xf32>
    %11 = vector.broadcast %10 : vector<1x128xf32> to vector<8x128xf32>
    %12 = arith.addf %9, %11 : vector<8x128xf32>
    %13 = tpu.iota {dimensions = array<i32: 1>} : vector<8x128xi32>
    %c4_i32 = arith.constant 4 : i32
    %14 = vector.broadcast %c4_i32 : i32 to vector<8x128xi32>
    %15 = arith.cmpi slt, %13, %14 : vector<8x128xi32>
    %cst_11 = arith.constant 0xFF800000 : f32
    %16 = vector.broadcast %cst_11 : f32 to vector<8x128xf32>
    %17 = arith.select %15, %12, %16 : vector<8x128xi1>, vector<8x128xf32>
    %cst_12 = arith.constant dense<0xFF800000> : vector<8xf32>
    %18 = vector.multi_reduction <maximumf>, %17, %cst_12 [1] : vector<8x128xf32> to vector<8xf32>
    %19 = vector.shape_cast %18 : vector<8xf32> to vector<8x1xf32>
    %20 = vector.broadcast %19 : vector<8x1xf32> to vector<8x128xf32>
    %21 = arith.subf %17, %20 : vector<8x128xf32>
    %22 = math.exp %21 : vector<8x128xf32>
    %cst_13 = arith.constant dense<0.000000e+00> : vector<8xf32>
    %23 = vector.multi_reduction <add>, %22, %cst_13 [1] : vector<8x128xf32> to vector<8xf32>
    %24 = vector.shape_cast %23 : vector<8xf32> to vector<8x1xf32>
    %25 = tpu.reciprocal %24 {approx = true} : vector<8x1xf32> -> vector<8x1xf32>
    %26 = vector.broadcast %25 : vector<8x1xf32> to vector<8x128xf32>
    %27 = arith.mulf %22, %26 : vector<8x128xf32>
    %c4_i32_14 = arith.constant 4 : i32
    %28 = vector.broadcast %c4_i32_14 : i32 to vector<8x128xi32>
    %29 = arith.cmpi eq, %13, %28 : vector<8x128xi32>
    %cst_15 = arith.constant 0.000000e+00 : f32
    %30 = vector.broadcast %cst_15 : f32 to vector<8x128xf32>
    %31 = arith.select %29, %12, %30 : vector<8x128xi1>, vector<8x128xf32>
    %32 = arith.addf %27, %31 : vector<8x128xf32>
    %c0_16 = arith.constant 0 : index
    %c0_17 = arith.constant 0 : index
    %33 = vector.load %arg6[%c0_16, %c0_17] : memref<8x128xf32, #tpu.memory_space<vmem>>, vector<8x128xf32>
    tpu.vector_store %arg6[%c0_16, %c0_17], %32 {strides = array<i32>} : memref<8x128xf32, #tpu.memory_space<vmem>>, vector<8x128xf32>,
    return
  }
  func.func @transform_0(%arg0: i32) -> (i32, i32) {
    %c0_i32 = arith.constant 0 : i32
    %c0_i32_0 = arith.constant 0 : i32
    return %arg0, %c0_i32 : i32, i32
  }
  func.func @transform_1(%arg0: i32) -> (i32, i32) {
    %c0_i32 = arith.constant 0 : i32
    %c0_i32_0 = arith.constant 0 : i32
    %c0_i32_1 = arith.constant 0 : i32
    return %c0_i32, %c0_i32_0 : i32, i32
  }
  func.func @transform_2(%arg0: i32) -> (i32, i32) {
    %c0_i32 = arith.constant 0 : i32
    %c0_i32_0 = arith.constant 0 : i32
    %c0_i32_1 = arith.constant 0 : i32
    return %c0_i32, %c0_i32_0 : i32, i32
  }
  func.func @transform_3(%arg0: i32) -> (i32, i32) {
    %c0_i32 = arith.constant 0 : i32
    %c0_i32_0 = arith.constant 0 : i32
    %c0_i32_1 = arith.constant 0 : i32
    return %c0_i32, %c0_i32_0 : i32, i32
  }
  func.func @transform_4(%arg0: i32) -> (i32, i32) {
    %c0_i32 = arith.constant 0 : i32
    %c0_i32_0 = arith.constant 0 : i32
    %c0_i32_1 = arith.constant 0 : i32
    return %c0_i32, %c0_i32_0 : i32, i32
  }
  func.func @transform_5(%arg0: i32) -> (i32, i32) {
    %c0_i32 = arith.constant 0 : i32
    %c0_i32_0 = arith.constant 0 : i32
    return %arg0, %c0_i32 : i32, i32
  }
}

</mosaic_0001>

<bundles_post_ra>
// kernel: actor_critic_forward.1
= control target key start
LH: loop header
LB: loop body
LE: loop exit
PB: predicated region body
PF: predicated region fallthrough
CT: control target
= control target key end

     0   :  { %v290_v3 = vmov 0.0   ;;  %vm41_vm0 = vcmask 261120   ;;  %v31_v42 = vlaneseq  ;;  %s453_s1 = inlined_call_operand.vmem [shape: f32[32,256], index: 1, kind: input, shape index: {}]   ;;  %s454_s3 = inlined_call_operand.vmem [shape: f32[256,128], index: 3, kind: input, shape index: {}]   ;;  %s455_s0 = inlined_call_operand.vmem [shape: f32[8,32], index: 0, kind: input, shape index: {}]   ;;  %s456_s2 = inlined_call_operand.vmem [shape: f32[1,256], index: 2, kind: input, shape index: {}]   ;;  %s457_s4 = inlined_call_operand.vmem [shape: f32[1,128], index: 4, kind: input, shape index: {}]   ;;  %s458_s5 = inlined_call_operand.vmem [shape: f32[8,128], index: 5, kind: output, shape index: {}]  }
   0x1   :  { %v28_v0 = vld [vmem:[%s453_s1 + $0x38] sm:$0xff]  ;;  %v27_v1 = vld [vmem:[%s453_s1 + $0x30] sm:$0xff]  ;;  %v26_v2 = vld [vmem:[%s453_s1 + $0x28] sm:$0xff]  ;;  %109 = vmatprep.mubr.f32.mxu0 %v290_v3 }
   0x2   :  { %69 = vmatprep.subr.mxu0 %v28_v0  ;;  %v25_v4 = vld [vmem:[%s453_s1 + $0x20] sm:$0xff]  ;;  %v24_v5 = vld [vmem:[%s453_s1 + $0x18] sm:$0xff]  ;;  %v23_v6 = vld [vmem:[%s453_s1 + $0x10] sm:$0xff]  ;;  %v32_v43 = vshrl.u32 %v31_v42, 7  ;;  %v228_v56 = vand.u32 127, %v31_v42 }
   0x3   :  { %70 = vmatpush1.msra.mxu0 %v27_v1  ;;  %v149_v7 = vld [vmem:[%s454_s3 + $0xf8] sm:$0xff]  ;;  %v148_v9 = vld [vmem:[%s454_s3 + $0xf0] sm:$0xff]  ;;  %v22_v10 = vld [vmem:[%s453_s1 + $0x8] sm:$0xff] }
   0x4   :  { %71 = vmatprep.subr.mxu0 %v26_v2  ;;  %v133_v8 = vld [vmem:[%s454_s3 + $0x78] sm:$0xff]  ;;  %250 = vmatprep.subr.mxu1 %v149_v7  ;;  %v132_v11 = vld [vmem:[%s454_s3 + $0x70] sm:$0xff]  ;;  %v21_v12 = vld [vmem:[%s453_s1] sm:$0xff]  ;;  %v33_v44 = vsub.s32 0, %v32_v43  ;;  %v37_v46 = vsub.s32 1, %v32_v43  ;;  %vm229_vm1 = vcmp.lt.s32.totalorder %v228_v56, 4 }
   0x5   :  { %72 = vmatpush1.msra.mxu0 %v25_v4  ;;  %251 = vmatpush3.msra.mxu1 %v133_v8  ;;  %v147_v13 = vld [vmem:[%s454_s3 + $0xe8] sm:$0xff]  ;;  %v20_v14 = vld [vmem:[%s455_s0] sm:$0xff]  ;;  %v145_v18 = vld [vmem:[%s454_s3 + $0xd8] sm:$0xff]  ;;  %vm240_vm2 = vcmp.eq.s32.totalorder %v228_v56, 4 }
   0x6   :  { %73 = vmatprep.subr.mxu0 %v24_v5  ;;  %252 = vmatprep.subr.mxu1 %v148_v9  ;;  %v131_v15 = vld [vmem:[%s454_s3 + $0x68] sm:$0xff]  ;;  %v146_v16 = vld [vmem:[%s454_s3 + $0xe0] sm:$0xff]  ;;  %v129_v19 = vld [vmem:[%s454_s3 + $0x58] sm:$0xff] }
   0x7   :  { %74 = vmatpush1.msra.mxu0 %v23_v6  ;;  %253 = vmatpush3.msra.mxu1 %v132_v11  ;;  %v130_v17 = vld [vmem:[%s454_s3 + $0x60] sm:$0xff]  ;;  %v144_v20 = vld [vmem:[%s454_s3 + $0xd0] sm:$0xff]  ;;  %v143_v22 = vld [vmem:[%s454_s3 + $0xc8] sm:$0xff] }
   0x8   :  { %75 = vmatprep.subr.mxu0 %v22_v10  ;;  %254 = vmatprep.subr.mxu1 %v147_v13  ;;  %v128_v21 = vld [vmem:[%s454_s3 + $0x50] sm:$0xff]  ;;  %v127_v23 = vld [vmem:[%s454_s3 + $0x48] sm:$0xff]  ;;  %v142_v24 = vld [vmem:[%s454_s3 + $0xc0] sm:$0xff] }
   0x9   :  { %76 = vmatpush1.msra.mxu0 %v21_v12  ;;  %255 = vmatpush3.msra.mxu1 %v131_v15  ;;  %v126_v25 = vld [vmem:[%s454_s3 + $0x40] sm:$0xff]  ;;  %v141_v26 = vld [vmem:[%s454_s3 + $0xb8] sm:$0xff]  ;;  %v140_v28 = vld [vmem:[%s454_s3 + $0xb0] sm:$0xff] }
   0xa   :  { %248 = vmatmul.mubr.msk.f32.vlgmr.msra.gmra.mxu0 %vm41_vm0, %v20_v14  ;;  %256 = vmatprep.subr.mxu1 %v146_v16  ;;  %v125_v27 = vld [vmem:[%s454_s3 + $0x38] sm:$0xff]  ;;  %v124_v29 = vld [vmem:[%s454_s3 + $0x30] sm:$0xff]  ;;  %v139_v30 = vld [vmem:[%s454_s3 + $0xa8] sm:$0xff] }
   0xb   :  { %257 = vmatpush3.msra.mxu1 %v130_v17  ;;  %v123_v31 = vld [vmem:[%s454_s3 + $0x28] sm:$0xff]  ;;  %v138_v32 = vld [vmem:[%s454_s3 + $0xa0] sm:$0xff]  ;;  %v137_v34 = vld [vmem:[%s454_s3 + $0x98] sm:$0xff] }
   0xc   :  { %258 = vmatprep.subr.mxu1 %v145_v18  ;;  %v122_v33 = vld [vmem:[%s454_s3 + $0x20] sm:$0xff]  ;;  %v121_v35 = vld [vmem:[%s454_s3 + $0x18] sm:$0xff]  ;;  %v136_v36 = vld [vmem:[%s454_s3 + $0x90] sm:$0xff] }
   0xd   :  { %259 = vmatpush3.msra.mxu1 %v129_v19  ;;  %v120_v37 = vld [vmem:[%s454_s3 + $0x10] sm:$0xff]  ;;  %v135_v38 = vld [vmem:[%s454_s3 + $0x88] sm:$0xff]  ;;  %v134_v40 = vld [vmem:[%s454_s3 + $0x80] sm:$0xff] }
   0xe   :  { %260 = vmatprep.subr.mxu1 %v144_v20  ;;  %v119_v39 = vld [vmem:[%s454_s3 + $0x8] sm:$0xff]  ;;  %v118_v41 = vld [vmem:[%s454_s3] sm:$0xff] }
   0xf   :  { %261 = vmatpush3.msra.mxu1 %v128_v21  ;;  %v29_v45 = vld [vmem:[%s456_s2] sm:$0x3] }
  0x10   :  { %262 = vmatprep.subr.mxu1 %v143_v22  ;;  %v34_v47 = vrot.slane %v29_v45, %v33_v44  ;;  %v38_v48 = vrot.slane %v29_v45, %v37_v46  ;;  %v249_v58 = vld [vmem:[%s457_s4] ss:$0 sm:$0xff] }
  0x11   :  { %263 = vmatpush3.msra.mxu1 %v127_v23 }
  0x12   :  { %264 = vmatprep.subr.mxu1 %v142_v24 }
  0x13   :  { %265 = vmatpush3.msra.mxu1 %v126_v25 }
  0x14   :  { %266 = vmatprep.subr.mxu1 %v141_v26 }
  0x15   :  { %267 = vmatpush3.msra.mxu1 %v125_v27 }
  0x16   :  { %268 = vmatprep.subr.mxu1 %v140_v28 }
  0x17   :  { %269 = vmatpush3.msra.mxu1 %v124_v29 }
  0x18   :  { %270 = vmatprep.subr.mxu1 %v139_v30 }
  0x19   :  { %271 = vmatpush3.msra.mxu1 %v123_v31 }
  0x1a   :  { %272 = vmatprep.subr.mxu1 %v138_v32 }
  0x1b   :  { %273 = vmatpush3.msra.mxu1 %v122_v33 }
  0x1c   :  { %274 = vmatprep.subr.mxu1 %v137_v34 }
  0x1d   :  { %275 = vmatpush3.msra.mxu1 %v121_v35 }
  0x1e   :  { %276 = vmatprep.subr.mxu1 %v136_v36 }
  0x1f   :  { %277 = vmatpush3.msra.mxu1 %v120_v37 }
  0x20   :  { %278 = vmatprep.subr.mxu1 %v135_v38 }
  0x21   :  { %279 = vmatpush3.msra.mxu1 %v119_v39 }
  0x22   :  { %280 = vmatprep.subr.mxu1 %v134_v40 }
  0x23   :  { %281 = vmatpush3.msra.mxu1 %v118_v41 }
  0xca   :  { %v111_v49 = vpop.f32.mrf.mxu0 }
  0xcb   :  { %v112_v50 = vadd.f32 %v111_v49, %v34_v47 }
  0xcc   :  { %v113_v51 = vpop.f32.mrf.mxu0 }
  0xcd   :  { %v114_v52 = vadd.f32 %v113_v51, %v38_v48  ;;  %v116_v54 = vmax.f32 %v112_v50, 0.0 }
  0xcf   :  { %v117_v53 = vmax.f32 %v114_v52, 0.0 }
  0xd1   :  { %221 = vmatprep.mubr.f32.mxu1 %v117_v53 }
  0xd2   :  { %222 = vmatmul.mubr.f32.vlgmr.msra.gmra.mxu1 %v116_v54 }
 0x192   :  { %v282_v55 = vpop.f32.mrf.mxu1 }
 0x194   :  { %v283_v57 = vpop.f32.mrf.mxu1 }
 0x195   :  { %v284_v59 = vadd.f32 %v283_v57, %v282_v55 }
 0x197   :  { %v224_v60 = vadd.f32 %v284_v59, %v249_v58 }
 0x199   :  { %v230_v61 = vsel %vm229_vm1, %v224_v60, -inf  ;;  %v241_v62 = vsel %vm240_vm2, %v224_v60, 0.0 }
 0x19a   :  { %231 = vmax.xlane.f32.xlu0 %v230_v61 }
 0x223   :  { %v232_v63 = vpop.xlane.xlu0 %231 }
 0x224   :  { %v233_v0 = vsub.f32 %v230_v61, %v232_v63 }
 0x226   :  { %v234_v1 = vmul.f32 1.442695, %v233_v0 }
 0x228   :  { %286 = vpow2.f32 %v234_v1 }
 0x235   :  { %v287_v2 = vpop.eup %286 }
 0x236   :  { %236 = vadd.xlane.f32.xlu0 %v287_v2 }
 0x2bf   :  { %v237_v3 = vpop.xlane.xlu0 %236 }
 0x2c0   :  { %288 = vrcp.f32 %v237_v3 }
 0x2cd   :  { %v289_v4 = vpop.eup %288 }
 0x2ce   :  { %v239_v5 = vmul.f32 %v289_v4, %v287_v2 }
 0x2d0   :  { %v242_v6 = vadd.f32 %v241_v62, %v239_v5 }
 0x2d2   :  { %243 = vst [vmem:[%s458_s5] sm:$0xff] %v242_v6 }

</bundles_post_ra>
